<compile_context>
chip_gen: v7x
topology: tpu7x:2x2x1
jax: 0.10.0
libtpu: 0.0.40
codegen_flags: <defaults>
</compile_context>

<pallas_src>
import jax
import jax.numpy as jnp
from jax.experimental import pallas as pl
from jax.experimental.pallas import tpu as pltpu

_LANES = 128
_TARGET_BLOCK_BYTES = 2 << 20   # ~2 MiB/block -> ~8 MiB working set with double-buffered in+out
_VMEM_LIMIT_BYTES = 32 << 20    # comfortable headroom even on v7x's 64 MiB VMEM


def _identity_kernel(x_ref, o_ref):
    # Pure copy: forward(x) == x.
    o_ref[...] = x_ref[...]


def _sublane_multiple(itemsize: int) -> int:
    # 4-byte -> 8 sublanes, 2-byte -> 16, 1-byte -> 32 (packed dtypes stack along sublanes).
    return max(8, 8 * (4 // max(1, itemsize)))


def _choose_cols(total: int, itemsize: int, orig_last: int) -> int:
    """Pick a lane-dense column count (multiple of 128) that divides `total`."""
    if total % _LANES != 0:
        # Cannot be made lane-dense without padding; keep the original trailing dim.
        return max(1, orig_last)
    sub = _sublane_multiple(itemsize)
    best = _LANES
    best_aligned = None
    max_cols = min(total, 4096)  # wide enough for unmasked vst; keep rows for tiling
    c = _LANES
    while c <= max_cols:
        if total % c == 0:
            best = c
            if (total // c) % sub == 0:
                best_aligned = c
        c += _LANES
    return best_aligned if best_aligned is not None else best


def _choose_block_rows(rows: int, cols: int, itemsize: int) -> int:
    """Byte-budgeted block rows (multiple of the dtype's sublane tile)."""
    sub = _sublane_multiple(itemsize)
    row_bytes = max(1, cols * itemsize)
    budget_rows = max(1, _TARGET_BLOCK_BYTES // row_bytes)
    br = (budget_rows // sub) * sub
    if br == 0:
        br = sub
    br = min(br, rows)
    if br >= rows:
        # Whole array fits in one budgeted block; if cleanly possible, split in
        # two so a parallel grid axis exists for v7x's dual TensorCores.
        if rows >= 2 * sub and rows % (2 * sub) == 0:
            return rows // 2
        return rows  # block == full extent (always a legal block shape)
    # Prefer a block that divides rows exactly (no masked tail).
    cand = br
    while cand >= sub:
        if rows % cand == 0:
            return cand
        cand -= sub
    return br  # non-dividing: cdiv grid + Pallas boundary masking handles the tail


def encoder_forward(x: jax.Array) -> jax.Array:
    """Identity forward pass of `Encoder`, run through a Pallas TPU kernel."""
    orig_shape = x.shape
    dtype = x.dtype
    total = int(x.size)

    if total == 0:
        return x  # nothing to copy

    itemsize = jnp.dtype(dtype).itemsize

    if x.ndim == 0:
        x2 = x.reshape(1, 1)
    else:
        orig_last = orig_shape[-1] if orig_shape[-1] > 0 else 1
        cols = _choose_cols(total, itemsize, orig_last)
        x2 = x.reshape(-1, cols)

    rows, cols = x2.shape
    block_rows = _choose_block_rows(rows, cols, itemsize)
    grid = (pl.cdiv(rows, block_rows),)

    out2 = pl.pallas_call(
        _identity_kernel,
        out_shape=jax.ShapeDtypeStruct((rows, cols), dtype),
        grid_spec=pl.GridSpec(
            grid=grid,
            in_specs=[pl.BlockSpec((block_rows, cols), lambda i: (i, 0))],
            out_specs=pl.BlockSpec((block_rows, cols), lambda i: (i, 0)),
        ),
        input_output_aliases={0: 0},
        cost_estimate=pl.CostEstimate(
            flops=0,
            transcendentals=0,
            bytes_accessed=2 * total * itemsize,
        ),
        compiler_params=pltpu.CompilerParams(
            dimension_semantics=("parallel",),
            vmem_limit_bytes=_VMEM_LIMIT_BYTES,
        ),
    )(x2)

    return out2.reshape(orig_shape)


if __name__ == "__main__":
    key = jax.random.PRNGKey(0)

    # Primary test: small NCHW input consistent with a VAE-encoder style module.
    x = jax.random.normal(key, (2, 4, 16, 16), dtype=jnp.float32)
    y = jax.block_until_ready(encoder_forward(x))
    assert y.shape == x.shape
    assert y.dtype == x.dtype
    assert bool(jnp.array_equal(y, x))

    # Secondary checks: packed dtype (bf16) and a lane-sparse odd shape.
    xb = jax.random.normal(jax.random.PRNGKey(1), (2, 3, 8, 8), dtype=jnp.bfloat16)
    yb = jax.block_until_ready(encoder_forward(xb))
    assert yb.shape == xb.shape and yb.dtype == xb.dtype
    assert bool(jnp.array_equal(yb, xb))

    xo = jax.random.normal(jax.random.PRNGKey(2), (3, 5, 7), dtype=jnp.float32)
    yo = jax.block_until_ready(encoder_forward(xo))
    assert yo.shape == xo.shape and yo.dtype == xo.dtype
    assert bool(jnp.array_equal(yo, xo))

    print("KERNEL_OK")
</pallas_src>

<mosaic_0001>
module attributes {stable_mosaic.version = 11 : i64} {
  func.func @_identity_kernel(%arg0: i32, %arg1: memref<8x256xf32, #tpu.memory_space<vmem>>, %arg2: memref<8x256xf32, #tpu.memory_space<vmem>>) attributes {dimension_semantics = [#tpu.dimension_semantics<parallel>], iteration_bounds = array<i64: 1>, scalar_prefetch = 0 : i64, scratch_operands = 0 : i64, tpu.core_type = #tpu.core_type<tc>, window_params = [{transform_indices = @transform_0, window_bounds = array<i64: 8, 256>}, {transform_indices = @transform_1, window_bounds = array<i64: 8, 256>}]} {
    %c0 = arith.constant 0 : index
    %c0_0 = arith.constant 0 : index
    %0 = vector.load %arg1[%c0, %c0_0] : memref<8x256xf32, #tpu.memory_space<vmem>>, vector<8x256xf32>
    %c0_1 = arith.constant 0 : index
    %c0_2 = arith.constant 0 : index
    %1 = vector.load %arg2[%c0_1, %c0_2] : memref<8x256xf32, #tpu.memory_space<vmem>>, vector<8x256xf32>
    tpu.vector_store %arg2[%c0_1, %c0_2], %0 {strides = array<i32>} : memref<8x256xf32, #tpu.memory_space<vmem>>, vector<8x256xf32>,
    return
  }
  func.func @transform_0(%arg0: i32) -> (i32, i32) {
    %c0_i32 = arith.constant 0 : i32
    %c0_i32_0 = arith.constant 0 : i32
    return %arg0, %c0_i32 : i32, i32
  }
  func.func @transform_1(%arg0: i32) -> (i32, i32) {
    %c0_i32 = arith.constant 0 : i32
    %c0_i32_0 = arith.constant 0 : i32
    return %arg0, %c0_i32 : i32, i32
  }
}

</mosaic_0001>

<bundles_post_ra>
// kernel: tpu_custom_call.1
= control target key start
LH: loop header
LB: loop body
LE: loop exit
PB: predicated region body
PF: predicated region fallthrough
CT: control target
= control target key end

     0   :  { %6 = vsyncpa [#allocation3], 0  ;;  %s126_s0 = inlined_call_operand.hbm [shape: f32[8,256], index: 0, kind: input, shape index: {}, may-alias: {0,1}]   ;;  %s127_s1 = inlined_call_operand.hbm [shape: f32[8,256], index: 1, kind: output, shape index: {}, may-alias: {0,1}]  }
   0x1   :  { %7 = vsyncpa [#allocation4], 0  ;;  %s90_s6 = smov [#allocation2]   ;;  %s42_s10 = scalar_lea.hbm %s126_s0, 256 }
   0x2   :  { %s14_s7 = sshll.u32 %s90_s6, 4  ;;  %p43_p0 = scmp.ne.s32.totalorder %s126_s0, %s42_s10  ;;  %s15_s7 = int_to_ptr.vmem [resolvable:$true] %s14_s7 }
   0x3   :  { %p46_p1 = scmp.lt.u32.totalorder %s42_s10, %s126_s0 }
   0x5   :  { %p48_p2 = pnand %p46_p1, %p43_p0 }
   0x7   :  { %51 = shalt.err (!%p48_p2)
}
   0x8   :  { %s52_s15 = scalar_lea.vmem %s15_s7, 256  ;;  %p57_p4 = scmp.lt.s32.totalorder %s15_s7, %s15_s7 }
   0x9   :  { %p53_p3 = scmp.ne.s32.totalorder %s15_s7, %s52_s15  ;;  %p58_p5 = scmp.lt.s32.totalorder %s52_s15, %s52_s15 }
   0xb   :  { %p59_p6 = por %p58_p5, %p57_p4 }
   0xd   :  { %p60_p7 = pnand %p59_p6, %p53_p3 }
   0xf   :  { %63 = shalt.err (!%p60_p7)
}
  0x10   :  { %17 = dma.hbm_to_vmem [thread:$0]  %s126_s0, 256, %s15_s7, [#allocation3]  }
  0x11   :  { %86 = dma.done.wait [#allocation3], 256  }
  0x12   :  { %87 = vsyncadd [#allocation3], 4294967040  ;;  %s91_s18 = smov [#allocation5]   ;;  %v21_v0 = vld [vmem:[#allocation2] sm:$0xff]  ;;  %v22_v1 = vld [vmem:[#allocation2 + $0x8] sm:$0xff] }
  0x13   :  { %s31_s19 = sshll.u32 %s91_s18, 4  ;;  %23 = vst [vmem:[#allocation5] sm:$0xff] %v21_v0  ;;  %24 = vst [vmem:[#allocation5 + $0x8] sm:$0xff] %v22_v1  ;;  %s32_s19 = int_to_ptr.vmem [resolvable:$true] %s31_s19 }
  0x14   :  { %s64_s20 = scalar_lea.vmem %s32_s19, 256  ;;  %p69_p9 = scmp.lt.s32.totalorder %s32_s19, %s32_s19 }
  0x15   :  { %p65_p8 = scmp.ne.s32.totalorder %s32_s19, %s64_s20  ;;  %p70_p10 = scmp.lt.s32.totalorder %s64_s20, %s64_s20 }
  0x17   :  { %p71_p11 = por %p70_p10, %p69_p9 }
  0x19   :  { %p72_p12 = pnand %p71_p11, %p65_p8 }
  0x1b   :  { %75 = shalt.err (!%p72_p12)
}
  0x1c   :  { %s76_s0 = scalar_lea.hbm %s127_s1, 256 }
  0x1d   :  { %p77_p13 = scmp.ne.s32.totalorder %s127_s1, %s76_s0  ;;  %p80_p0 = scmp.lt.u32.totalorder %s76_s0, %s127_s1 }
  0x1f   :  { %p82_p1 = pnand %p80_p0, %p77_p13 }
  0x21   :  { %85 = shalt.err (!%p82_p1)
}
  0x22   :  { %34 = dma.vmem_to_hbm [thread:$0]  %s32_s19, 256, %s127_s1, [#allocation4]  }
  0x23   :  { %88 = dma.done.wait [#allocation4], 256  }
  0x24   :  { %89 = vsyncadd [#allocation4], 4294967040 }
  0x25   :  { %38 = vsyncpa [#allocation3], 1 }
  0x26   :  { %39 = vsyncpa [#allocation4], 1 }

</bundles_post_ra>
